<compile_context>
chip_gen: v7x
topology: tpu7x:2x2x1
jax: 0.10.0
libtpu: 0.0.40
codegen_flags: <defaults>
</compile_context>

<pallas_src>
import functools

import jax
import jax.numpy as jnp
from jax.experimental import pallas as pl
from jax.experimental.pallas import tpu as pltpu


# ---------------------------------------------------------------------------
# Fused Pallas kernel: the whole MLP on one batch tile (transposed layout)
# ---------------------------------------------------------------------------
def _fused_mlp_kernel(*refs, modes):
    """refs = (x_t, w0, b0, w1, b1, ..., w_{L-1}, b_{L-1}, out_t).

    Activations are [features, batch_tile]; biases are columns [out, 1].
    `modes[layer]` selects the compute path and implies the weight layout:
      "outer"  : w is [out, in]  with in  <= 8  -> VPU outer product
      "reduce" : w is [in, out]  with out <= 8  -> VPU mul + XLU sublane-sum
      "mxu"    : w is [out, in]                 -> MXU matmul
    """
    x_ref = refs[0]
    o_ref = refs[-1]
    wb = refs[1:-1]
    num_layers = len(modes)

    h = x_ref[...].astype(jnp.float32)                      # [k0, tile]
    for layer, mode in enumerate(modes):
        w = wb[2 * layer][...]
        b = wb[2 * layer + 1][...]                          # [out, 1]
        if mode == "outer":
            # Tiny contracting dim (first layer, K=2): VPU outer product —
            # avoids wasting the MXU on a 2-deep matmul.
            k_in = w.shape[1]
            y = b + w[:, 0:1] * h[0:1, :]
            for k in range(1, k_in):
                y = y + w[:, k:k + 1] * h[k:k + 1, :]
        elif mode == "reduce":
            # Tiny output dim (last layer, out=1): per-row broadcast multiply
            # + sublane reduce (VPU + XLU slots, no under-filled vmatmul/vpop).
            # Here w was passed pre-transposed: [k_in, out_rows].
            out_rows = w.shape[1]
            parts = [jnp.sum(w[:, r:r + 1] * h, axis=0, keepdims=True)
                     for r in range(out_rows)]
            y = (parts[0] if out_rows == 1
                 else jnp.concatenate(parts, axis=0)) + b
        else:
            # Lane-dense MXU matmul: minor dim is the (128-multiple) batch tile.
            y = jnp.dot(w, h, preferred_element_type=jnp.float32) + b
        if 0 < layer < num_layers - 1:                      # relu on layers 1..n-2
            y = jnp.maximum(y, 0.0)
        h = y
    o_ref[...] = h.astype(o_ref.dtype)


# ---------------------------------------------------------------------------
# Wrapper: pad + transpose batch, tile it, call the fused kernel once
# ---------------------------------------------------------------------------
def net_smooth_forward(params, x, *, batch_tile=4096):
    """Exact semantics of Net_smooth.forward, fused into one Pallas kernel.

    x: [M, in_features] float32 -> [M, out_features] float32.
    `batch_tile` must be a multiple of 128; sweep 2048-8192 for large M.
    """
    assert batch_tile % 128 == 0
    M, k0 = x.shape
    assert k0 == params[0][0].shape[1], (k0, params[0][0].shape)
    out_dim = params[-1][0].shape[0]
    num_layers = len(params)

    # Batch tile: multiple of 128 (lane-dense), capped so that num_tiles >= 2
    # whenever M > 256 (keeps both v7x TensorCores busy; harmless on v5e/v6e).
    tile_cap = max(128, 128 * pl.cdiv(M, 2 * 128))
    tile = min(batch_tile, tile_cap)
    num_tiles = pl.cdiv(M, tile)
    m_pad = num_tiles * tile

    # Transposed, lane-dense input [features, padded_batch] via one fused pad.
    x_t = jnp.pad(x, ((0, m_pad - M), (0, 0))).T

    args = [x_t]
    in_specs = [pl.BlockSpec((k0, tile), lambda i: (0, i))]
    modes = []
    for w, b in params:
        out_f, in_f = w.shape
        if in_f <= 8:
            modes.append("outer")
            w_arg = w                       # [out, in]
        elif out_f <= 8:
            modes.append("reduce")
            w_arg = w.T                     # pre-transpose: [in, out]
        else:
            modes.append("mxu")
            w_arg = w                       # [out, in]
        b_col = b.reshape(-1, 1)
        args.append(w_arg)
        args.append(b_col)
        # Constant block index -> parameters stay VMEM-resident across tiles.
        in_specs.append(pl.BlockSpec(w_arg.shape, lambda i: (0, 0)))
        in_specs.append(pl.BlockSpec(b_col.shape, lambda i: (0, 0)))

    kernel = functools.partial(_fused_mlp_kernel, modes=tuple(modes))
    out_t = pl.pallas_call(
        kernel,
        out_shape=jax.ShapeDtypeStruct((out_dim, m_pad), x.dtype),
        grid_spec=pltpu.PrefetchScalarGridSpec(
            num_scalar_prefetch=0,
            grid=(num_tiles,),
            in_specs=in_specs,
            out_specs=pl.BlockSpec((out_dim, tile), lambda i: (0, i)),
        ),
        compiler_params=pltpu.CompilerParams(
            dimension_semantics=("parallel",)),   # shards tiles across TCs on v7x
    )(*args)

    # Back to [M, out_features]; avoid a transpose copy for the common out=1.
    if out_dim == 1:
        return out_t[0, :M].reshape(M, 1)
    return out_t[:, :M].T


# ---------------------------------------------------------------------------
# Parameters (mirrors the PyTorch init) and a plain-JAX reference
# ---------------------------------------------------------------------------
def init_net_smooth_params(key, layer_sizes):
    """Xavier-normal weights (gain=1), zero biases; weights in PyTorch
    layout [out_features, in_features]."""
    params = []
    for i in range(len(layer_sizes) - 1):
        fan_in, fan_out = layer_sizes[i], layer_sizes[i + 1]
        key, sub = jax.random.split(key)
        std = (2.0 / (fan_in + fan_out)) ** 0.5          # xavier_normal_, gain=1
        w = std * jax.random.normal(sub, (fan_out, fan_in), dtype=jnp.float32)
        b = jnp.zeros((fan_out,), dtype=jnp.float32)
        params.append((w, b))
    return params


def net_smooth_reference(params, x):
    """Plain-JAX reference matching torch forward: Wz[0], relu(Wz[1:-1]), Wz[-1]."""
    w0, b0 = params[0]
    h = x @ w0.T + b0
    for w, b in params[1:-1]:
        h = jnp.maximum(h @ w.T + b, 0.0)
    w_last, b_last = params[-1]
    return h @ w_last.T + b_last


if __name__ == "__main__":
    # MLP mapping 2-D coords -> 1 value (as in the FWI script).
    layer_sizes = [2, 32, 32, 32, 1]

    key = jax.random.PRNGKey(0)
    key_x_small, key_x_big, key_p = jax.random.split(key, 3)
    params = init_net_smooth_params(key_p, layer_sizes)

    # Small case (single batch tile).
    batch = 16
    x = jax.random.uniform(key_x_small, (batch, layer_sizes[0]), dtype=jnp.float32)
    out = jax.block_until_ready(net_smooth_forward(params, x))
    ref = net_smooth_reference(params, x)
    assert out.shape == (batch, layer_sizes[-1]), out.shape
    assert jnp.allclose(out, ref, atol=1e-5, rtol=1e-5), "mismatch vs reference (small)"

    # Larger case exercising batch padding + multiple grid tiles (>= 2 tiles).
    batch_big = 700
    x_big = jax.random.uniform(key_x_big, (batch_big, layer_sizes[0]), dtype=jnp.float32)
    out_big = jax.block_until_ready(net_smooth_forward(params, x_big))
    ref_big = net_smooth_reference(params, x_big)
    assert out_big.shape == (batch_big, layer_sizes[-1]), out_big.shape
    assert jnp.allclose(out_big, ref_big, atol=1e-5, rtol=1e-5), "mismatch vs reference (big)"

    print("KERNEL_OK")
</pallas_src>

<mosaic_0001>
module attributes {stable_mosaic.version = 11 : i64} {
  func.func @_fused_mlp_kernel(%arg0: i32, %arg1: memref<2x128xf32, #tpu.memory_space<vmem>>, %arg2: memref<32x2xf32, #tpu.memory_space<vmem>>, %arg3: memref<32x1xf32, #tpu.memory_space<vmem>>, %arg4: memref<32x32xf32, #tpu.memory_space<vmem>>, %arg5: memref<32x1xf32, #tpu.memory_space<vmem>>, %arg6: memref<32x32xf32, #tpu.memory_space<vmem>>, %arg7: memref<32x1xf32, #tpu.memory_space<vmem>>, %arg8: memref<32x1xf32, #tpu.memory_space<vmem>>, %arg9: memref<1x1xf32, #tpu.memory_space<vmem>>, %arg10: memref<1x128xf32, #tpu.memory_space<vmem>>) attributes {dimension_semantics = [#tpu.dimension_semantics<parallel>], iteration_bounds = array<i64: 1>, scalar_prefetch = 0 : i64, scratch_operands = 0 : i64, tpu.core_type = #tpu.core_type<tc>, window_params = [{transform_indices = @transform_0, window_bounds = array<i64: 2, 128>}, {pipeline_mode = #tpu.pipeline_mode<synchronous>, transform_indices = @transform_1, window_bounds = array<i64: 32, 2>}, {pipeline_mode = #tpu.pipeline_mode<synchronous>, transform_indices = @transform_2, window_bounds = array<i64: 32, 1>}, {pipeline_mode = #tpu.pipeline_mode<synchronous>, transform_indices = @transform_3, window_bounds = array<i64: 32, 32>}, {pipeline_mode = #tpu.pipeline_mode<synchronous>, transform_indices = @transform_4, window_bounds = array<i64: 32, 1>}, {pipeline_mode = #tpu.pipeline_mode<synchronous>, transform_indices = @transform_5, window_bounds = array<i64: 32, 32>}, {pipeline_mode = #tpu.pipeline_mode<synchronous>, transform_indices = @transform_6, window_bounds = array<i64: 32, 1>}, {pipeline_mode = #tpu.pipeline_mode<synchronous>, transform_indices = @transform_7, window_bounds = array<i64: 32, 1>}, {pipeline_mode = #tpu.pipeline_mode<synchronous>, transform_indices = @transform_8, window_bounds = array<i64: 1, 1>}, {transform_indices = @transform_9, window_bounds = array<i64: 1, 128>}]} {
    %c0 = arith.constant 0 : index
    %c0_0 = arith.constant 0 : index
    %0 = vector.load %arg1[%c0, %c0_0] : memref<2x128xf32, #tpu.memory_space<vmem>>, vector<2x128xf32>
    %c0_1 = arith.constant 0 : index
    %c0_2 = arith.constant 0 : index
    %1 = vector.load %arg2[%c0_1, %c0_2] : memref<32x2xf32, #tpu.memory_space<vmem>>, vector<32x2xf32>
    %c0_3 = arith.constant 0 : index
    %c0_4 = arith.constant 0 : index
    %2 = vector.load %arg3[%c0_3, %c0_4] : memref<32x1xf32, #tpu.memory_space<vmem>>, vector<32x1xf32>
    %3 = vector.extract_strided_slice %1 {offsets = [0, 0], sizes = [32, 1], strides = [1, 1]} : vector<32x2xf32> to vector<32x1xf32>
    %4 = vector.extract_strided_slice %0 {offsets = [0, 0], sizes = [1, 128], strides = [1, 1]} : vector<2x128xf32> to vector<1x128xf32>
    %5 = vector.broadcast %3 : vector<32x1xf32> to vector<32x128xf32>
    %6 = vector.broadcast %4 : vector<1x128xf32> to vector<32x128xf32>
    %7 = arith.mulf %5, %6 : vector<32x128xf32>
    %8 = vector.broadcast %2 : vector<32x1xf32> to vector<32x128xf32>
    %9 = arith.addf %8, %7 : vector<32x128xf32>
    %10 = vector.extract_strided_slice %1 {offsets = [0, 1], sizes = [32, 1], strides = [1, 1]} : vector<32x2xf32> to vector<32x1xf32>
    %11 = vector.extract_strided_slice %0 {offsets = [1, 0], sizes = [1, 128], strides = [1, 1]} : vector<2x128xf32> to vector<1x128xf32>
    %12 = vector.broadcast %10 : vector<32x1xf32> to vector<32x128xf32>
    %13 = vector.broadcast %11 : vector<1x128xf32> to vector<32x128xf32>
    %14 = arith.mulf %12, %13 : vector<32x128xf32>
    %15 = arith.addf %9, %14 : vector<32x128xf32>
    %c0_5 = arith.constant 0 : index
    %c0_6 = arith.constant 0 : index
    %16 = vector.load %arg4[%c0_5, %c0_6] : memref<32x32xf32, #tpu.memory_space<vmem>>, vector<32x32xf32>
    %c0_7 = arith.constant 0 : index
    %c0_8 = arith.constant 0 : index
    %17 = vector.load %arg5[%c0_7, %c0_8] : memref<32x1xf32, #tpu.memory_space<vmem>>, vector<32x1xf32>
    %cst = arith.constant dense<0.000000e+00> : vector<32x128xf32>
    %18 = tpu.matmul %16, %15, %cst {dimension_numbers = #tpu.dot_dimension_numbers<[1], [0], [0], [1], [0, 0, 1, 1], [], []>} : vector<32x32xf32>, vector<32x128xf32>, vector<32x128xf32> -> vector<32x128xf32>
    %19 = vector.broadcast %17 : vector<32x1xf32> to vector<32x128xf32>
    %20 = arith.addf %18, %19 : vector<32x128xf32>
    %cst_9 = arith.constant 0.000000e+00 : f32
    %21 = vector.broadcast %cst_9 : f32 to vector<32x128xf32>
    %22 = arith.maximumf %20, %21 : vector<32x128xf32>
    %c0_10 = arith.constant 0 : index
    %c0_11 = arith.constant 0 : index
    %23 = vector.load %arg6[%c0_10, %c0_11] : memref<32x32xf32, #tpu.memory_space<vmem>>, vector<32x32xf32>
    %c0_12 = arith.constant 0 : index
    %c0_13 = arith.constant 0 : index
    %24 = vector.load %arg7[%c0_12, %c0_13] : memref<32x1xf32, #tpu.memory_space<vmem>>, vector<32x1xf32>
    %cst_14 = arith.constant dense<0.000000e+00> : vector<32x128xf32>
    %25 = tpu.matmul %23, %22, %cst_14 {dimension_numbers = #tpu.dot_dimension_numbers<[1], [0], [0], [1], [0, 0, 1, 1], [], []>} : vector<32x32xf32>, vector<32x128xf32>, vector<32x128xf32> -> vector<32x128xf32>
    %26 = vector.broadcast %24 : vector<32x1xf32> to vector<32x128xf32>
    %27 = arith.addf %25, %26 : vector<32x128xf32>
    %cst_15 = arith.constant 0.000000e+00 : f32
    %28 = vector.broadcast %cst_15 : f32 to vector<32x128xf32>
    %29 = arith.maximumf %27, %28 : vector<32x128xf32>
    %c0_16 = arith.constant 0 : index
    %c0_17 = arith.constant 0 : index
    %30 = vector.load %arg8[%c0_16, %c0_17] : memref<32x1xf32, #tpu.memory_space<vmem>>, vector<32x1xf32>
    %c0_18 = arith.constant 0 : index
    %c0_19 = arith.constant 0 : index
    %31 = vector.load %arg9[%c0_18, %c0_19] : memref<1x1xf32, #tpu.memory_space<vmem>>, vector<1x1xf32>
    %32 = vector.broadcast %30 : vector<32x1xf32> to vector<32x128xf32>
    %33 = arith.mulf %32, %29 : vector<32x128xf32>
    %cst_20 = arith.constant dense<0.000000e+00> : vector<128xf32>
    %34 = vector.multi_reduction <add>, %33, %cst_20 [0] : vector<32x128xf32> to vector<128xf32>
    %35 = vector.shape_cast %34 : vector<128xf32> to vector<1x128xf32>
    %36 = vector.broadcast %31 : vector<1x1xf32> to vector<1x128xf32>
    %37 = arith.addf %35, %36 : vector<1x128xf32>
    %c0_21 = arith.constant 0 : index
    %c0_22 = arith.constant 0 : index
    %38 = vector.load %arg10[%c0_21, %c0_22] : memref<1x128xf32, #tpu.memory_space<vmem>>, vector<1x128xf32>
    tpu.vector_store %arg10[%c0_21, %c0_22], %37 {strides = array<i32>} : memref<1x128xf32, #tpu.memory_space<vmem>>, vector<1x128xf32>,
    return
  }
  func.func @transform_0(%arg0: i32) -> (i32, i32) {
    %c0_i32 = arith.constant 0 : i32
    %c0_i32_0 = arith.constant 0 : i32
    return %c0_i32, %arg0 : i32, i32
  }
  func.func @transform_1(%arg0: i32) -> (i32, i32) {
    %c0_i32 = arith.constant 0 : i32
    %c0_i32_0 = arith.constant 0 : i32
    %c0_i32_1 = arith.constant 0 : i32
    return %c0_i32, %c0_i32_0 : i32, i32
  }
  func.func @transform_2(%arg0: i32) -> (i32, i32) {
    %c0_i32 = arith.constant 0 : i32
    %c0_i32_0 = arith.constant 0 : i32
    %c0_i32_1 = arith.constant 0 : i32
    return %c0_i32, %c0_i32_0 : i32, i32
  }
  func.func @transform_3(%arg0: i32) -> (i32, i32) {
    %c0_i32 = arith.constant 0 : i32
    %c0_i32_0 = arith.constant 0 : i32
    %c0_i32_1 = arith.constant 0 : i32
    return %c0_i32, %c0_i32_0 : i32, i32
  }
  func.func @transform_4(%arg0: i32) -> (i32, i32) {
    %c0_i32 = arith.constant 0 : i32
    %c0_i32_0 = arith.constant 0 : i32
    %c0_i32_1 = arith.constant 0 : i32
    return %c0_i32, %c0_i32_0 : i32, i32
  }
  func.func @transform_5(%arg0: i32) -> (i32, i32) {
    %c0_i32 = arith.constant 0 : i32
    %c0_i32_0 = arith.constant 0 : i32
    %c0_i32_1 = arith.constant 0 : i32
    return %c0_i32, %c0_i32_0 : i32, i32
  }
  func.func @transform_6(%arg0: i32) -> (i32, i32) {
    %c0_i32 = arith.constant 0 : i32
    %c0_i32_0 = arith.constant 0 : i32
    %c0_i32_1 = arith.constant 0 : i32
    return %c0_i32, %c0_i32_0 : i32, i32
  }
  func.func @transform_7(%arg0: i32) -> (i32, i32) {
    %c0_i32 = arith.constant 0 : i32
    %c0_i32_0 = arith.constant 0 : i32
    %c0_i32_1 = arith.constant 0 : i32
    return %c0_i32, %c0_i32_0 : i32, i32
  }
  func.func @transform_8(%arg0: i32) -> (i32, i32) {
    %c0_i32 = arith.constant 0 : i32
    %c0_i32_0 = arith.constant 0 : i32
    %c0_i32_1 = arith.constant 0 : i32
    return %c0_i32, %c0_i32_0 : i32, i32
  }
  func.func @transform_9(%arg0: i32) -> (i32, i32) {
    %c0_i32 = arith.constant 0 : i32
    %c0_i32_0 = arith.constant 0 : i32
    return %c0_i32, %arg0 : i32, i32
  }
}

</mosaic_0001>

<bundles_post_ra>
// kernel: tpu_custom_call.1
= control target key start
LH: loop header
LB: loop body
LE: loop exit
PB: predicated region body
PF: predicated region fallthrough
CT: control target
= control target key end

     0   :  { %s720_s0 = inlined_call_operand.vmem [shape: f32[2,128], index: 0, kind: input, shape index: {}]   ;;  %s721_s1 = inlined_call_operand.vmem [shape: f32[32,2], index: 1, kind: input, shape index: {}]   ;;  %s722_s2 = inlined_call_operand.vmem [shape: f32[32,1], index: 2, kind: input, shape index: {}]   ;;  %s723_s3 = inlined_call_operand.vmem [shape: f32[32,32], index: 3, kind: input, shape index: {}]   ;;  %s724_s4 = inlined_call_operand.vmem [shape: f32[32,1], index: 4, kind: input, shape index: {}]   ;;  %s725_s5 = inlined_call_operand.vmem [shape: f32[32,32], index: 5, kind: input, shape index: {}]   ;;  %s726_s6 = inlined_call_operand.vmem [shape: f32[32,1], index: 6, kind: input, shape index: {}]   ;;  %s727_s7 = inlined_call_operand.vmem [shape: f32[32,1], index: 7, kind: input, shape index: {}]   ;;  %s728_s8 = inlined_call_operand.<no memory space> [shape: f32[1,1], index: 8, kind: input, shape index: {}]   ;;  %s729_s9 = inlined_call_operand.hbm [shape: f32[1,128], index: 9, kind: output, shape index: {}]  }
   0x1   :  { %v14_v0 = vstv %s728_s8 }
   0x2   :  { %15 = vst [vmem:[#allocation2] sm:$0x1] %v14_v0 }
   0x3   :  { %v40_v1 = vld [vmem:[%s722_s2] sm:$0xff]  ;;  %v549_v3 = vmov 0   ;;  %v41_v4 = vld [vmem:[%s722_s2 + $0x8] sm:$0xff] }
   0x4   :  { %v36_v2 = vld [vmem:[%s721_s1] sm:$0xff]  ;;  %518 = vset.pattern.permute.xlu1 %v549_v3  ;;  %517 = vset.pattern.permute.xlu0 %v549_v3  ;;  %v37_v5 = vld [vmem:[%s721_s1 + $0x8] sm:$0xff] }
   0x5   :  { %74 = vperm.xlu1 %518, %v40_v1   ;;  %46 = vperm.xlu0 %517, %v36_v2  }
   0x6   :  { %16 = vsyncpa [#allocation4], 0  ;;  %v39_v6 = vld [vmem:[%s721_s1 + $0x18] sm:$0xff]  ;;  %v550_v7 = vmov 1   ;;  %v38_v8 = vld [vmem:[%s721_s1 + $0x10] sm:$0xff]  ;;  %vm152_vm0 = vcmask 261120   ;;  %v64_v25 = vlaneseq }
   0x7   :  { %v42_v9 = vld [vmem:[%s722_s2 + $0x10] sm:$0xff]  ;;  %v43_v10 = vld [vmem:[%s722_s2 + $0x18] sm:$0xff]  ;;  %v124_v11 = vld [vmem:[%s723_s3] sm:$0xff] }
   0x8   :  { %478 = vmatprep.mubr.msk.f32.mxu0 %vm152_vm0, %v124_v11  ;;  %v128_v12 = vld [vmem:[%s724_s4] sm:$0xff]  ;;  %v129_v13 = vld [vmem:[%s724_s4 + $0x8] sm:$0xff]  ;;  %v130_v14 = vld [vmem:[%s724_s4 + $0x10] sm:$0xff]  ;;  %v669_v26 = vshrl.u32 %v64_v25, 7 }
   0x9   :  { %79 = vperm.xlu1 %518, %v41_v4   ;;  %51 = vperm.xlu0 %517, %v37_v5   ;;  %v258_v15 = vld [vmem:[%s726_s6] sm:$0xff]  ;;  %v131_v16 = vld [vmem:[%s724_s4 + $0x18] sm:$0xff]  ;;  %v260_v17 = vld [vmem:[%s726_s6 + $0x10] sm:$0xff] }
   0xa   :  { %v259_v18 = vld [vmem:[%s726_s6 + $0x8] sm:$0xff]  ;;  %v383_v19 = vld [vmem:[%s727_s7] sm:$0xff]  ;;  %v261_v20 = vld [vmem:[%s726_s6 + $0x18] sm:$0xff]  ;;  %v66_v29 = vsub.s32 0, %v669_v26  ;;  %v114_v33 = vsub.s32 1, %v669_v26 }
   0xb   :  { %v385_v21 = vld [vmem:[%s727_s7 + $0x10] sm:$0xff]  ;;  %v384_v22 = vld [vmem:[%s727_s7 + $0x8] sm:$0xff]  ;;  %v387_v23 = vld [vmem:[#allocation2] sm:$0x1] }
   0xc   :  { %v386_v24 = vld [vmem:[%s727_s7 + $0x18] sm:$0xff]  ;;  %v35_v30 = vld [vmem:[%s720_s0] sm:$0x3]  ;;  %v125_v62 = vld [vmem:[%s723_s3 + $0x8] sm:$0xff] }
   0xd   :  { %519 = vset.pattern.permute.xlu1 %v550_v7  ;;  %61 = vperm.xlu0 %517, %v39_v6   ;;  %v67_v34 = vrot.slane %v35_v30, %v66_v29  ;;  %v115_v35 = vrot.slane %v35_v30, %v114_v33  ;;  %v126_v63 = vld [vmem:[%s723_s3 + $0x10] sm:$0xff]  ;;  %v127_v0 = vld [vmem:[%s723_s3 + $0x18] sm:$0xff]  ;;  %v254_v1 = vld [vmem:[%s725_s5] sm:$0xff] }
   0xe   :  { %101 = vperm.xlu1 %519, %v37_v5   ;;  %492 = vmatprep.mubr.msk.f32.mxu1 %vm152_vm0, %v254_v1 }
  0x11   :  { %521 = vset.pattern.permute.xlu0 %v550_v7 }
  0x12   :  { %520 = vset.pattern.permute.xlu1 %v549_v3  ;;  %97 = vperm.xlu0 %521, %v36_v2  }
  0x13   :  { %56 = vperm.xlu1 %520, %v38_v8  }
  0x16   :  { %105 = vperm.xlu0 %521, %v38_v8  }
  0x17   :  { %84 = vperm.xlu1 %520, %v42_v9  }
  0x1a   :  { %524 = vset.pattern.permute.xlu0 %v549_v3 }
  0x1b   :  { %89 = vperm.xlu1 %520, %v43_v10   ;;  %139 = vperm.xlu0 %524, %v129_v13  }
  0x1f   :  { %522 = vset.pattern.permute.xlu1 %v550_v7  ;;  %264 = vperm.xlu0 %524, %v258_v15  }
  0x20   :  { %109 = vperm.xlu1 %522, %v39_v6  }
  0x23   :  { %274 = vperm.xlu0 %524, %v260_v17  }
  0x24   :  { %523 = vset.pattern.permute.xlu1 %v549_v3 }
  0x25   :  { %134 = vperm.xlu1 %523, %v128_v12  }
  0x27   :  { %390 = vperm.xlu0 %524, %v383_v19  }
  0x29   :  { %144 = vperm.xlu1 %523, %v130_v14  }
  0x2b   :  { %400 = vperm.xlu0 %524, %v385_v21   ;;  %v256_v21 = vld [vmem:[%s725_s5 + $0x10] sm:$0xff] }
  0x2d   :  { %149 = vperm.xlu1 %523, %v131_v16  }
  0x2f   :  { %423 = vperm.xlu0 %524, %v387_v23  }
  0x31   :  { %269 = vperm.xlu1 %523, %v259_v18  }
  0x35   :  { %279 = vperm.xlu1 %523, %v261_v20   ;;  %v255_v20 = vld [vmem:[%s725_s5 + $0x8] sm:$0xff] }
  0x39   :  { %395 = vperm.xlu1 %523, %v384_v22   ;;  %v257_v22 = vld [vmem:[%s725_s5 + $0x18] sm:$0xff]  ;;  %s551_s5 = smov [#allocation3]  }
  0x3a   :  { %s438_s16 = sshll.u32 %s551_s5, 4  ;;  %s439_s16 = int_to_ptr.vmem [resolvable:$true] %s438_s16 }
  0x3b   :  { %s525_s17 = scalar_lea.vmem %s439_s16, 16  ;;  %s529_s8 = scalar_lea.vmem %s439_s16, 32 }
  0x3c   :  { %p526_p0 = scmp.ne.s32.totalorder %s439_s16, %s525_s17  ;;  %p530_p1 = scmp.lt.s32.totalorder %s439_s16, %s439_s16 }
  0x3d   :  { %405 = vperm.xlu1 %523, %v386_v24   ;;  %p531_p2 = scmp.lt.s32.totalorder %s529_s8, %s525_s17 }
  0x3f   :  { %p532_p3 = por %p531_p2, %p530_p1 }
  0x41   :  { %p533_p4 = pnand %p532_p3, %p526_p0 }
  0x84   :  { %v75_v27 = vpop.permute.xlu1 %74  ;;  %v47_v28 = vpop.permute.xlu0 %46 }
  0x85   :  { %v68_v38 = vmul.f32 %v67_v34, %v47_v28 }
  0x87   :  { %v92_v42 = vadd.f32 %v75_v27, %v68_v38 }
  0x88   :  { %v80_v31 = vpop.permute.xlu1 %79  ;;  %v52_v32 = vpop.permute.xlu0 %51 }
  0x89   :  { %v69_v39 = vmul.f32 %v67_v34, %v52_v32 }
  0x8b   :  { %v93_v43 = vadd.f32 %v80_v31, %v69_v39 }
  0x8c   :  { %v62_v36 = vpop.permute.xlu0 %61 }
  0x8d   :  { %v102_v37 = vpop.permute.xlu1 %101  ;;  %v71_v53 = vmul.f32 %v67_v34, %v62_v36 }
  0x8e   :  { %v117_v40 = vmul.f32 %v115_v35, %v102_v37 }
  0x90   :  { %v121_v46 = vadd.f32 %v117_v40, %v93_v43 }
  0x91   :  { %v98_v41 = vpop.permute.xlu0 %97 }
  0x92   :  { %v116_v44 = vmul.f32 %v115_v35, %v98_v41  ;;  %v57_v45 = vpop.permute.xlu1 %56 }
  0x93   :  { %v70_v52 = vmul.f32 %v67_v34, %v57_v45 }
  0x94   :  { %v120_v47 = vadd.f32 %v116_v44, %v92_v42 }
  0x95   :  { %v106_v51 = vpop.permute.xlu0 %105 }
  0x96   :  { %v85_v48 = vpop.permute.xlu1 %84  ;;  %v498_v49 = vpack.c.bf16 %v121_v46, %v120_v47  ;;  %v118_v55 = vmul.f32 %v115_v35, %v106_v51 }
  0x97   :  { %v94_v54 = vadd.f32 %v85_v48, %v70_v52 }
  0x98   :  { %499 = vmatprep.subr.bf16.mxu0 %v498_v49 }
  0x99   :  { %501 = vmatpush3.bf16.msra.mxu0 %v498_v49  ;;  %v122_v59 = vadd.f32 %v118_v55, %v94_v54 }
  0x9a   :  { %v90_v50 = vpop.permute.xlu1 %89  ;;  %v140_v4 = vpop.permute.xlu0 %139 }
  0x9b   :  { %v95_v57 = vadd.f32 %v90_v50, %v71_v53 }
  0x9e   :  { %v265_v23 = vpop.permute.xlu0 %264 }
  0x9f   :  { %v110_v56 = vpop.permute.xlu1 %109 }
  0xa0   :  { %v119_v58 = vmul.f32 %v115_v35, %v110_v56 }
  0xa2   :  { %v123_v60 = vadd.f32 %v119_v58, %v95_v57  ;;  %v275_v25 = vpop.permute.xlu0 %274 }
  0xa4   :  { %v502_v61 = vpack.c.bf16 %v123_v60, %v122_v59  ;;  %v135_v2 = vpop.permute.xlu1 %134 }
  0xa6   :  { %503 = vmatprep.subr.bf16.mxu0 %v502_v61  ;;  %v391_v33 = vpop.permute.xlu0 %390 }
  0xa7   :  { %505 = vmatpush3.bf16.msra.mxu0 %v502_v61 }
  0xa8   :  { %v145_v3 = vpop.permute.xlu1 %144 }
  0xaa   :  { %479 = vmatmul.mubr.msk.f32.vlgmr.msra.gmra.mrb[0].mxu0 %vm152_vm0, %v125_v62  ;;  %v401_v46 = vpop.permute.xlu0 %400 }
  0xab   :  { %481 = vmatprep.mubr.msk.f32.mxu0 %vm152_vm0, %v126_v63 }
  0xac   :  { %v150_v10 = vpop.permute.xlu1 %149 }
  0xae   :  { %482 = vmatmul.mubr.msk.f32.gmra.mrb[2].mxu0 %vm152_vm0, %v127_v0  ;;  %v424_v56 = vpop.permute.xlu0 %423 }
  0xaf   :  { %v429_v58 = vrot.slane %v424_v56, %v66_v29 }
  0xb0   :  { %v270_v24 = vpop.permute.xlu1 %269 }
  0xb4   :  { %v280_v27 = vpop.permute.xlu1 %279 }
  0xb8   :  { %v396_v35 = vpop.permute.xlu1 %395 }
  0xbc   :  { %v406_v48 = vpop.permute.xlu1 %405 }
 0x17d   :  { %v480_v5 = vpop.f32.mrb[0].mxu0 }
 0x17e   :  { %v237_v6 = vadd.f32 %v480_v5, %v140_v4  ;;  %v231_v7 = vpop.f32.mrb[1].mxu0 }
 0x17f   :  { %v232_v8 = vadd.f32 %v231_v7, %v135_v2 }
 0x180   :  { %v251_v9 = vmax.f32 %v237_v6, 0.0 }
 0x181   :  { %v250_v11 = vmax.f32 %v232_v8, 0.0  ;;  %v483_v12 = vpop.f32.mrb[2].mxu0 }
 0x182   :  { %v247_v13 = vadd.f32 %v483_v12, %v150_v10  ;;  %v241_v14 = vpop.f32.mrb[3].mxu0 }
 0x183   :  { %v242_v15 = vadd.f32 %v241_v14, %v145_v3  ;;  %v506_v16 = vpack.c.bf16 %v251_v9, %v250_v11 }
 0x184   :  { %v253_v17 = vmax.f32 %v247_v13, 0.0 }
 0x185   :  { %v252_v18 = vmax.f32 %v242_v15, 0.0  ;;  %507 = vmatprep.subr.bf16.mxu1 %v506_v16 }
 0x186   :  { %509 = vmatpush3.bf16.msra.mxu1 %v506_v16 }
 0x187   :  { %v510_v19 = vpack.c.bf16 %v253_v17, %v252_v18 }
 0x189   :  { %511 = vmatprep.subr.bf16.mxu1 %v510_v19 }
 0x18a   :  { %513 = vmatpush3.bf16.msra.mxu1 %v510_v19 }
 0x18d   :  { %493 = vmatmul.mubr.msk.f32.vlgmr.msra.gmra.mrb[0].mxu1 %vm152_vm0, %v255_v20 }
 0x18e   :  { %495 = vmatprep.mubr.msk.f32.mxu1 %vm152_vm0, %v256_v21 }
 0x191   :  { %496 = vmatmul.mubr.msk.f32.gmra.mrb[2].mxu1 %vm152_vm0, %v257_v22 }
 0x260   :  { %v494_v28 = vpop.f32.mrb[0].mxu1 }
 0x261   :  { %v366_v30 = vadd.f32 %v494_v28, %v270_v24  ;;  %v360_v31 = vpop.f32.mrb[1].mxu1 }
 0x262   :  { %v361_v32 = vadd.f32 %v360_v31, %v265_v23 }
 0x263   :  { %v380_v34 = vmax.f32 %v366_v30, 0.0 }
 0x264   :  { %v379_v36 = vmax.f32 %v361_v32, 0.0  ;;  %v497_v37 = vpop.f32.mrb[2].mxu1 }
 0x265   :  { %v409_v38 = vmul.f32 %v396_v35, %v380_v34  ;;  %v376_v39 = vadd.f32 %v497_v37, %v280_v27  ;;  %v370_v40 = vpop.f32.mrb[3].mxu1 }
 0x266   :  { %v408_v41 = vmul.f32 %v391_v33, %v379_v36  ;;  %v371_v42 = vadd.f32 %v370_v40, %v275_v25 }
 0x267   :  { %v382_v44 = vmax.f32 %v376_v39, 0.0 }
 0x268   :  { %v412_v43 = vadd.f32 %v409_v38, %v408_v41  ;;  %v381_v45 = vmax.f32 %v371_v42, 0.0 }
 0x269   :  { %v411_v49 = vmul.f32 %v406_v48, %v382_v44 }
 0x26a   :  { %v410_v47 = vmul.f32 %v401_v46, %v381_v45 }
 0x26c   :  { %v413_v50 = vadd.f32 %v412_v43, %v410_v47 }
 0x26e   :  { %v414_v51 = vadd.f32 %v413_v50, %v411_v49 }
 0x270   :  { %v415_v52 = vrot.slane %v414_v51, 4 }
 0x272   :  { %v416_v53 = vadd.f32 %v415_v52, %v414_v51 }
 0x274   :  { %v417_v54 = vrot.slane %v416_v53, 2 }
 0x276   :  { %v418_v55 = vadd.f32 %v417_v54, %v416_v53 }
 0x278   :  { %v419_v57 = vrot.slane %v418_v55, 1 }
 0x27a   :  { %v420_v59 = vadd.f32 %v419_v57, %v418_v55 }
 0x27c   :  { %v430_v60 = vadd.f32 %v429_v58, %v420_v59 }
 0x27e   :  { %431 = vst [vmem:[#allocation3] sm:$0x1] %v430_v60 }
 0x27f   :  { %536 = shalt.err (!%p533_p4)
}
 0x280   :  { %s537_s20 = scalar_lea.hbm %s729_s9, 16 }
 0x281   :  { %p538_p5 = scmp.ne.s32.totalorder %s729_s9, %s537_s20  ;;  %p541_p6 = scmp.lt.u32.totalorder %s537_s20, %s729_s9 }
 0x283   :  { %p543_p7 = pnand %p541_p6, %p538_p5 }
 0x285   :  { %546 = shalt.err (!%p543_p7)
}
 0x286   :  { %441 = dma.vmem_to_hbm [thread:$0]  %s439_s16, 16, %s729_s9, [#allocation4]  }
 0x287   :  { %547 = dma.done.wait [#allocation4], 16  }
 0x288   :  { %548 = vsyncadd [#allocation4], 4294967280 }
 0x289   :  { %445 = vsyncpa [#allocation4], 1 }

</bundles_post_ra>
